<compile_context>
chip_gen: v5e
topology: v5e:2x2
jax: 0.10.0
libtpu: 0.0.40
codegen_flags: <defaults>
</compile_context>

<pallas_src>
import functools
import math

import jax
import jax.numpy as jnp
from jax.experimental import pallas as pl
from jax.experimental.pallas import tpu as pltpu


# ---------------------------------------------------------------------------
# small host-side helpers
# ---------------------------------------------------------------------------

def _largest_divisor_leq(n, cap):
    """Largest divisor of `n` that is <= cap (>= 1)."""
    cap = max(1, min(n, cap))
    for d in range(cap, 0, -1):
        if n % d == 0:
            return d
    return 1


def _aligned_divisor(n, align, cap):
    """Largest d with d % align == 0, d | n, d <= cap.  Assumes align | n."""
    q = _largest_divisor_leq(n // align, max(1, cap // align))
    return align * q


# ---------------------------------------------------------------------------
# kernels
# ---------------------------------------------------------------------------

def _fftshift_flat_kernel(x_ref, need_ref, o_ref, *, W, shift_flat):
    """Block = (n_blk, Lc): a lane-dense chunk of whole image rows (Lc % W == 0)."""
    x = x_ref[...]
    lc = x.shape[-1]
    if shift_flat:
        # H half-roll on the flattened axis (shift_flat == Lc // 2, H even):
        # a half-rotation is direction-agnostic, so a single XLU roll is exact.
        x = pltpu.roll(x, shift_flat, axis=1)
    # W half-swap: out[.., h*W + w] = x[.., h*W + (w + W//2) % W].
    # Implemented as a select between the two opposite lane rotations by W//2.
    # The same rotation is applied to an index row, so `ia` reports which flat
    # index `a` holds at each lane -> correct regardless of roll direction.
    half = W // 2
    f = jax.lax.broadcasted_iota(jnp.int32, (1, lc), 1)
    ia = pltpu.roll(f, half, axis=1)
    a = pltpu.roll(x, half, axis=1)
    b = pltpu.roll(x, lc - half, axis=1)
    o_ref[...] = jnp.where(ia == need_ref[...], a, b)


def _roll_even_or_exact(x, shift, axis):
    """Roll by `shift` along `axis` with torch cat([after, before]) semantics."""
    axis = axis % x.ndim
    dim = x.shape[axis]
    if shift == 0:
        return x
    if dim % 2 == 0 and shift == dim // 2:
        # Half-roll of an even dim is direction-agnostic -> single XLU rotate.
        return pltpu.roll(x, shift, axis)
    # Odd dim (cold path): keep the exact, direction-proof cat([after, before]).
    # TODO(synk): replace with a single pltpu.roll once its rotation direction
    # is verified on hardware against jnp.roll (== cat([after, before])).
    before = jax.lax.slice_in_dim(x, 0, dim - shift, axis=axis)
    after = jax.lax.slice_in_dim(x, dim - shift, dim, axis=axis)
    return jnp.concatenate([after, before], axis=axis)


def _fftshift_axes_kernel(x_ref, o_ref, *, shift_h, shift_w):
    x = x_ref[...]                                   # (n_blk, h_blk, w_blk)
    if shift_h:                                      # static flags
        x = _roll_even_or_exact(x, shift_h, axis=-2)
    if shift_w:
        x = _roll_even_or_exact(x, shift_w, axis=-1)
    o_ref[...] = x


# ---------------------------------------------------------------------------
# pallas_call builders
# ---------------------------------------------------------------------------

def _fftshift_flat_lane_dense(x3):
    """H, W even and W not a multiple of 128: operate on the free (BC, H*W)
    reshape so loads/stores are lane-dense.  Returns None if no aligned
    chunking of the flat axis exists (caller falls back to the per-axis path)."""
    BC, H, W = x3.shape
    L = H * W
    itemsize = jnp.dtype(x3.dtype).itemsize

    # ~2 MiB slab (in-kernel rolls create ~3 extra tile-sized temporaries);
    # keep the flat chunk small enough that >= 8 BC rows fit the slab so the
    # sublane-dim block can stay a multiple of 8.
    slab_elems = (2 << 20) // itemsize
    c_cap = max(128, slab_elems // 8)

    if L <= c_cap:
        # Whole image per block: H half-roll done in-kernel (one XLU rotate).
        c_blk, n_c, sb, shift_flat = L, 1, 0, L // 2
    else:
        # Chunk the flat axis into lane-dense groups of whole rows such that
        # the H half-roll is a pure block permutation via the out index_map.
        unit = (W * 128) // math.gcd(W, 128)            # lcm(W, 128)
        if unit > c_cap or (L // 2) % unit != 0:
            return None
        c_blk = _aligned_divisor(L // 2, unit, c_cap)
        n_c, sb, shift_flat = L // c_blk, (L // 2) // c_blk, 0

    n_cap = max(8, slab_elems // c_blk)
    n_blk = BC if BC <= n_cap else (n_cap // 8) * 8     # mult-of-8 or full dim
    grid = (pl.cdiv(BC, n_blk), n_c)

    # Per-lane "wanted source index" for the W half-swap (period W, identical
    # for every chunk); computed outside the kernel so no in-kernel int mod.
    half = W // 2
    fidx = jnp.arange(c_blk, dtype=jnp.int32)
    need_row = (fidx + jnp.where(fidx % W < half, half, -half)
                ).astype(jnp.int32).reshape(1, c_blk)

    def in_map(i, c):
        return (i, c)

    def out_map(i, c):
        return (i, (c + sb) % n_c if sb else c)

    tile_bytes = n_blk * c_blk * itemsize
    live = 8 * tile_bytes                      # double-buffered IO + roll temps
    vmem_limit = int(min(48 << 20, max(32 << 20, 2 * live)))

    kernel = functools.partial(_fftshift_flat_kernel, W=W, shift_flat=shift_flat)
    out = pl.pallas_call(
        kernel,
        out_shape=jax.ShapeDtypeStruct((BC, L), x3.dtype),
        grid_spec=pltpu.PrefetchScalarGridSpec(
            num_scalar_prefetch=0,
            grid=grid,
            in_specs=[pl.BlockSpec((n_blk, c_blk), in_map),
                      pl.BlockSpec((1, c_blk), lambda i, c: (0, 0))],
            out_specs=pl.BlockSpec((n_blk, c_blk), out_map)),
        compiler_params=pltpu.CompilerParams(
            dimension_semantics=("parallel", "parallel"),
            vmem_limit_bytes=vmem_limit),
        cost_estimate=pl.CostEstimate(
            flops=0, transcendentals=0,
            bytes_accessed=2 * BC * L * itemsize),
    )(x3.reshape(BC, L), need_row)
    return out.reshape(BC, H, W)


def _fftshift_per_axis(x3):
    BC, H, W = x3.shape
    itemsize = jnp.dtype(x3.dtype).itemsize
    sublane = max(8, 32 // itemsize)              # 8 f32 / 16 bf16 / 32 int8
    shift_h, shift_w = H // 2, W // 2

    # Which half-swaps are expressible purely through the output index_map
    # (half aligned to the lane / sublane tile)?
    w_dma = W % 2 == 0 and shift_w > 0 and shift_w % 128 == 0
    h_dma = H % 2 == 0 and shift_h > 0 and shift_h % sublane == 0
    pure_copy = (w_dma or shift_w == 0) and (h_dma or shift_h == 0)

    # Slab budget: 4 MiB for a pure DMA memcpy body, 2 MiB if in-kernel rolls
    # materialize temporaries.  All block dims are capped from this budget.
    slab_elems = ((4 << 20) if pure_copy else (2 << 20)) // itemsize

    if w_dma:
        room = sublane if h_dma else H            # rows forced into the block
        w_cap = max(128, slab_elems // max(1, room))
        w_blk = _aligned_divisor(shift_w, 128, w_cap)
        n_w, sw, shift_w_in = W // w_blk, shift_w // w_blk, 0
    else:
        # In-kernel roll needs the whole W extent per block.
        # TODO(synk): a huge unaligned W together with an unaligned H would
        # need a two-pass split to bound VMEM; not needed for realistic sizes.
        w_blk, n_w, sw, shift_w_in = W, 1, 0, shift_w

    if h_dma:
        h_cap = max(sublane, slab_elems // w_blk)
        h_blk = _aligned_divisor(shift_h, sublane, h_cap)
        n_h, sh, shift_h_in = H // h_blk, shift_h // h_blk, 0
    else:
        h_blk, n_h, sh, shift_h_in = H, 1, 0, shift_h

    # Fold batch*channel into the leading block dim (ragged tail allowed).
    n_blk = max(1, min(BC, slab_elems // max(1, h_blk * w_blk)))
    grid = (pl.cdiv(BC, n_blk), n_h, n_w)

    def in_map(i, h, w):
        return (i, h, w)

    def out_map(i, h, w):
        return (i,
                (h + sh) % n_h if sh else h,
                (w + sw) % n_w if sw else w)

    tile_bytes = n_blk * h_blk * w_blk * itemsize
    live = (4 if pure_copy else 7) * tile_bytes
    vmem_limit = int(min(48 << 20, max(32 << 20, 2 * live)))

    kernel = functools.partial(_fftshift_axes_kernel,
                               shift_h=shift_h_in, shift_w=shift_w_in)
    return pl.pallas_call(
        kernel,
        out_shape=jax.ShapeDtypeStruct((BC, H, W), x3.dtype),
        grid_spec=pltpu.PrefetchScalarGridSpec(
            num_scalar_prefetch=0,
            grid=grid,
            in_specs=[pl.BlockSpec((n_blk, h_blk, w_blk), in_map)],
            out_specs=pl.BlockSpec((n_blk, h_blk, w_blk), out_map)),
        compiler_params=pltpu.CompilerParams(
            dimension_semantics=("parallel", "parallel", "parallel"),
            vmem_limit_bytes=vmem_limit),
        cost_estimate=pl.CostEstimate(
            flops=0, transcendentals=0,
            bytes_accessed=2 * BC * H * W * itemsize),
    )(x3)


# ---------------------------------------------------------------------------
# public wrapper
# ---------------------------------------------------------------------------

def fftshift_pallas(x, startdim: int = 2):
    """Pallas TPU fftshift(ndims=4, startdim=2) for an NCHW tensor."""
    assert x.ndim == 4 and startdim == 2, "kernel implements the NCHW / startdim=2 case"
    B, C, H, W = x.shape
    x3 = x.reshape(B * C, H, W)                  # free reshape
    out3 = None
    if H % 2 == 0 and W % 2 == 0 and W % 128 != 0:
        out3 = _fftshift_flat_lane_dense(x3)     # lane-dense path (small W)
    if out3 is None:
        out3 = _fftshift_per_axis(x3)            # aligned / odd-dim path
    return out3.reshape(B, C, H, W)


def _fftshift_reference(x):
    # Pure-JAX mirror of the PyTorch module (verification only).
    for axis in (2, 3):
        n = x.shape[axis]
        s = n // 2
        before = jax.lax.slice_in_dim(x, 0, n - s, axis=axis)
        after = jax.lax.slice_in_dim(x, n - s, n, axis=axis)
        x = jnp.concatenate([after, before], axis=axis)
    return x


if __name__ == "__main__":
    key = jax.random.PRNGKey(0)

    # Primary case: flat lane-dense path (W = 16 < 128), whole image per block.
    x = jax.random.normal(key, (2, 4, 16, 16), dtype=jnp.float32)
    out = jax.block_until_ready(fftshift_pallas(x))
    ref = _fftshift_reference(x)
    assert out.shape == ref.shape and out.dtype == ref.dtype
    assert bool(jnp.all(out == ref))

    # Lane-aligned case: both half-swaps done purely via the output index_map
    # (kernel body degenerates to a DMA memcpy).
    x2 = jax.random.normal(jax.random.PRNGKey(1), (1, 2, 16, 256), dtype=jnp.float32)
    out2 = jax.block_until_ready(fftshift_pallas(x2))
    assert bool(jnp.all(out2 == _fftshift_reference(x2)))

    # Non-power-of-two W on the flat lane-dense path.
    x3 = jax.random.normal(jax.random.PRNGKey(2), (2, 3, 32, 48), dtype=jnp.float32)
    out3 = jax.block_until_ready(fftshift_pallas(x3))
    assert bool(jnp.all(out3 == _fftshift_reference(x3)))

    print("KERNEL_OK")
</pallas_src>

<mosaic_0001>
module attributes {stable_mosaic.version = 11 : i64} {
  func.func @_fftshift_flat_kernel(%arg0: i32, %arg1: i32, %arg2: memref<8x256xf32, #tpu.memory_space<vmem>>, %arg3: memref<1x256xi32, #tpu.memory_space<vmem>>, %arg4: memref<8x256xf32, #tpu.memory_space<vmem>>) attributes {dimension_semantics = [#tpu.dimension_semantics<parallel>, #tpu.dimension_semantics<parallel>], iteration_bounds = array<i64: 1, 1>, scalar_prefetch = 0 : i64, scratch_operands = 0 : i64, tpu.core_type = #tpu.core_type<tc>, window_params = [{transform_indices = @transform_0, window_bounds = array<i64: 8, 256>}, {pipeline_mode = #tpu.pipeline_mode<synchronous>, transform_indices = @transform_1, window_bounds = array<i64: 1, 256>}, {transform_indices = @transform_2, window_bounds = array<i64: 8, 256>}]} {
    %c0 = arith.constant 0 : index
    %c0_0 = arith.constant 0 : index
    %0 = vector.load %arg2[%c0, %c0_0] : memref<8x256xf32, #tpu.memory_space<vmem>>, vector<8x256xf32>
    %c128_i32 = arith.constant 128 : i32
    %1 = tpu.dynamic_rotate %0 by %c128_i32 dim 1 : vector<8x256xf32>, i32 -> vector<8x256xf32>
    %2 = tpu.iota {dimensions = array<i32: 1>} : vector<1x256xi32>
    %c8_i32 = arith.constant 8 : i32
    %3 = tpu.dynamic_rotate %2 by %c8_i32 dim 1 : vector<1x256xi32>, i32 -> vector<1x256xi32>
    %c8_i32_1 = arith.constant 8 : i32
    %4 = tpu.dynamic_rotate %1 by %c8_i32_1 dim 1 : vector<8x256xf32>, i32 -> vector<8x256xf32>
    %c248_i32 = arith.constant 248 : i32
    %5 = tpu.dynamic_rotate %1 by %c248_i32 dim 1 : vector<8x256xf32>, i32 -> vector<8x256xf32>
    %c0_2 = arith.constant 0 : index
    %c0_3 = arith.constant 0 : index
    %6 = vector.load %arg3[%c0_2, %c0_3] : memref<1x256xi32, #tpu.memory_space<vmem>>, vector<1x256xi32>
    %7 = arith.cmpi eq, %3, %6 : vector<1x256xi32>
    %8 = vector.shape_cast %7 : vector<1x256xi1> to vector<1x256xi1>
    %9 = vector.broadcast %8 : vector<1x256xi1> to vector<8x256xi1>
    %10 = arith.select %9, %4, %5 : vector<8x256xi1>, vector<8x256xf32>
    %c0_4 = arith.constant 0 : index
    %c0_5 = arith.constant 0 : index
    %11 = vector.load %arg4[%c0_4, %c0_5] : memref<8x256xf32, #tpu.memory_space<vmem>>, vector<8x256xf32>
    tpu.vector_store %arg4[%c0_4, %c0_5], %10 {strides = array<i32>} : memref<8x256xf32, #tpu.memory_space<vmem>>, vector<8x256xf32>,
    return
  }
  func.func @transform_0(%arg0: i32, %arg1: i32) -> (i32, i32) {
    %c0_i32 = arith.constant 0 : i32
    return %arg0, %arg1 : i32, i32
  }
  func.func @transform_1(%arg0: i32, %arg1: i32) -> (i32, i32) {
    %c0_i32 = arith.constant 0 : i32
    %c0_i32_0 = arith.constant 0 : i32
    %c0_i32_1 = arith.constant 0 : i32
    return %c0_i32, %c0_i32_0 : i32, i32
  }
  func.func @transform_2(%arg0: i32, %arg1: i32) -> (i32, i32) {
    %c0_i32 = arith.constant 0 : i32
    return %arg0, %arg1 : i32, i32
  }
}

</mosaic_0001>

<bundles_post_ra>
// kernel: tpu_custom_call.1
= control target key start
LH: loop header
LB: loop body
LE: loop exit
PB: predicated region body
PF: predicated region fallthrough
CT: control target
= control target key end

     0   :  { %7 = vsyncpa [#allocation3], 0  ;;  %s216_s0 = inlined_call_operand.hbm [shape: f32[8,256], index: 0, kind: input, shape index: {}]   ;;  %s217_s1 = inlined_call_operand.hbm [shape: s32[1,256], index: 1, kind: input, shape index: {}]   ;;  %s218_s2 = inlined_call_operand.hbm [shape: f32[8,256], index: 2, kind: output, shape index: {}]  }
   0x1   :  { %8 = vsyncpa [#allocation6], 0 }
   0x2   :  { %9 = vsyncpa [#allocation4], 0  ;;  %s15_s11 = sshll.u32 %s216_s0, 4  ;;  %s182_s12 = smov [#allocation2]   ;;  %s16_s11 = int_to_ptr.hbm [resolvable:$true] %s15_s11 }
   0x3   :  { %s17_s13 = sshll.u32 %s182_s12, 4  ;;  %s26_s16 = sshll.u32 %s217_s1, 4  ;;  %s18_s13 = int_to_ptr.vmem [resolvable:$true] %s17_s13  ;;  %s27_s16 = int_to_ptr.hbm [resolvable:$true] %s26_s16 }
   0x4   :  { %20 = dma.hbm_to_vmem [thread:$0]  %s16_s11, 256, %s18_s13, [#allocation3]  }
   0x5   :  { %s183_s17 = smov [#allocation5]  }
   0x6   :  { %s28_s18 = sshll.u32 %s183_s17, 4  ;;  %s29_s18 = int_to_ptr.vmem [resolvable:$true] %s28_s18 }
   0x7   :  { %31 = dma.hbm_to_vmem [thread:$0]  %s27_s16, 32, %s29_s18, [#allocation6]  }
   0x8   :  { %176 = dma.done.wait [#allocation3], 256  }
   0x9   :  { %177 = vsyncadd [#allocation3], 4294967040 }
   0xa   :  { %178 = dma.done.wait [#allocation6], 32  }
   0xb   :  { %179 = vsyncadd [#allocation6], 4294967264  ;;  %v42_v0 = vlaneseq  ;;  %s184_s0 = smov 8   ;;  %v41_v2 = vld [vmem:[#allocation2 + $0x8] sm:$0xff]  ;;  %s185_s19 = smov 120   ;;  %v40_v4 = vld [vmem:[#allocation2] sm:$0xff] }
   0xc   :  { %52 = vrot.lane.b32.xlu1 %v41_v2, %s184_s0  ;;  %58 = vrot.lane.b32.xlu2 %v41_v2, %s185_s19  ;;  %v65_v7 = vld [vmem:[#allocation5] sm:$0x3]  ;;  %v186_v15 = vmov 0   ;;  %s187_s1 = smov [#allocation7]   ;;  %s87_s23 = sshll.u32 %s218_s2, 4  ;;  %s88_s23 = int_to_ptr.hbm [resolvable:$true] %s87_s23 }
   0xd   :  { %v43_v1 = vand.u32 127, %v42_v0  ;;  %v66_v9 = vperm.slane %v65_v7, 0  ;;  %v67_v10 = vperm.slane %v65_v7, 1  ;;  %s85_s20 = sshll.u32 %s187_s1, 4  ;;  %s86_s20 = int_to_ptr.vmem [resolvable:$true] %s85_s20 }
   0xf   :  { %45 = vrot.lane.b32.xlu0 %v43_v1, %s184_s0  ;;  %v44_v3 = vadd.s32 128, %v43_v1  ;;  %vm49_vm0 = vcmp.lt.s32.totalorder %v43_v1, 8  ;;  %vm62_vm3 = vcmp.lt.s32.totalorder %v43_v1, 120 }
  0x14   :  { %54 = vrot.lane.b32.xlu1 %v40_v4, %s184_s0  ;;  %60 = vrot.lane.b32.xlu2 %v40_v4, %s185_s19 }
  0x17   :  { %47 = vrot.lane.b32.xlu0 %v44_v3, %s184_s0 }
  0x66   :  { %v59_v6 = vpop.permute.xlu2 %58 }
  0x6e   :  { %v61_v14 = vpop.permute.xlu2 %60 }
  0x6f   :  { %v63_v23 = vsel %vm62_vm3, %v59_v6, %v61_v14  ;;  %v64_v24 = vsel %vm62_vm3, %v61_v14, %v59_v6 }
  0x7e   :  { %v53_v8 = vpop.permute.xlu1 %52 }
  0x81   :  { %v46_v5 = vpop.permute.xlu0 %45 }
  0x86   :  { %v55_v20 = vpop.permute.xlu1 %54 }
  0x87   :  { %v56_v21 = vsel %vm49_vm0, %v53_v8, %v55_v20  ;;  %v57_v22 = vsel %vm49_vm0, %v55_v20, %v53_v8 }
  0x89   :  { %v48_v11 = vpop.permute.xlu0 %47 }
  0x8a   :  { %v50_v12 = vsel %vm49_vm0, %v46_v5, %v48_v11  ;;  %v51_v13 = vsel %vm49_vm0, %v48_v11, %v46_v5 }
  0x8b   :  { %vm68_vm1 = vcmp.eq.s32.totalorder %v51_v13, %v66_v9  ;;  %vm69_vm2 = vcmp.eq.s32.totalorder %v50_v12, %v67_v10 }
  0x8c   :  { %v70_v16 = vsel %vm68_vm1, 1, %v186_v15  ;;  %v71_v17 = vsel %vm69_vm2, 1, %v186_v15 }
  0x8d   :  { %v72_v18 = vperm.slane %v70_v16, 0  ;;  %v73_v19 = vperm.slane %v71_v17, 0 }
  0x8f   :  { %vm74_vm4 = vcmp.eq.s32.totalorder %v72_v18, 1  ;;  %vm75_vm5 = vcmp.eq.s32.totalorder %v73_v19, 1 }
  0x90   :  { %v76_v25 = vsel %vm74_vm4, %v57_v22, %v63_v23  ;;  %v77_v26 = vsel %vm75_vm5, %v56_v21, %v64_v24 }
  0x91   :  { %78 = vst [vmem:[#allocation7] sm:$0xff] %v76_v25 }
  0x92   :  { %79 = vst [vmem:[#allocation7 + $0x8] sm:$0xff] %v77_v26 }
  0x93   :  { %90 = dma.vmem_to_hbm [thread:$0]  %s86_s20, 256, %s88_s23, [#allocation4]  }
  0x94   :  { %180 = dma.done.wait [#allocation4], 256  }
  0x95   :  { %181 = vsyncadd [#allocation4], 4294967040 }
  0x96   :  { %95 = vsyncpa [#allocation3], 1 }
  0x97   :  { %96 = vsyncpa [#allocation6], 1 }
  0x98   :  { %97 = vsyncpa [#allocation4], 1 }

</bundles_post_ra>
